<compile_context>
chip_gen: v7x
topology: tpu7x:2x2x1
jax: 0.10.0
libtpu: 0.0.40
codegen_flags: <defaults>
</compile_context>

<pallas_src>
import jax
import jax.numpy as jnp
from jax.experimental import pallas as pl
from jax.experimental.pallas import tpu as pltpu


_VMEM_BUDGET = 24 * 1024 * 1024  # conservative; fits scoped defaults on v5e/v6e/v7x


def _round_up(x, m):
    return ((x + m - 1) // m) * m


def ed_layer_kernel(x_ref, w_ref, b_ref, o_ref):
    """One (tm, tn) output tile; full K in a single MXU pass, bias fused."""
    # In-kernel cast: VPU work hidden under the MXU / weight DMA, avoids a
    # separate XLA op that writes a bf16 copy of x to HBM and reads it back.
    x = x_ref[...].astype(w_ref.dtype)
    acc = jnp.dot(x, w_ref[...], preferred_element_type=jnp.float32)
    o_ref[...] = (acc + b_ref[...]).astype(o_ref.dtype)


def prepare_ed_layer_params(w_p, b_p, w_n, b_n, *, compute_dtype=jnp.bfloat16):
    """One-time parameter prep (hoisted off the hot path).

    w_p / w_n: (out_features, input_size) PyTorch layout.
    Returns:
      w_fused: (K, Np) = concat([w_p.T, w_n.T], axis=0), N zero-padded to a
               multiple of 128 (lane-dense stores), cast to compute_dtype.
               K = 2*input_size is left at its natural size (full-extent block).
      bias:    (1, Np) f32, = (b_p + b_n) zero-padded.
      out_features: true (unpadded) N.
    """
    N, K = w_p.shape
    assert w_n.shape == (N, K)
    w = jnp.concatenate([w_p.T, w_n.T], axis=0)            # (2K, N)
    bias = (b_p + b_n).reshape(1, N).astype(jnp.float32)

    Np = _round_up(N, 128)
    w = jnp.pad(w, ((0, 0), (0, Np - N))).astype(compute_dtype)
    bias = jnp.pad(bias, ((0, 0), (0, Np - N)))
    return w, bias, N


def ed_layer_forward(x, w_fused, bias, out_features, *, out_dtype=None):
    """x: (B, 2*input_size) float32.  w_fused/bias from prepare_ed_layer_params."""
    B, K = x.shape
    Kw, Np = w_fused.shape
    assert Kw == K, (Kw, K)
    assert bias.shape == (1, Np)
    N = out_features
    out_dtype = x.dtype if out_dtype is None else jnp.dtype(out_dtype)
    out_isz = jnp.dtype(out_dtype).itemsize

    # ---- N tiling (Np is a multiple of 128 by construction) ---------------
    if Np <= 512:
        tn = Np                      # weight fully resident across the grid
    else:
        tn = 128
        for t in (512, 256):
            if Np % t == 0:
                tn = t
                break
    num_n = Np // tn

    # ---- M tiling: big tiles, never degrade to tm=8 for awkward B ---------
    def _vmem_bytes(tm_, tn_):
        # double-buffered x, w, bias, out tiles
        return 2 * (tm_ * K * 4 + K * tn_ * 2 + tn_ * 4 + tm_ * tn_ * out_isz)

    tm_cap = 512
    while tm_cap > 64 and _vmem_bytes(tm_cap, tn) > _VMEM_BUDGET:
        tm_cap //= 2
    # TODO(synk): add a K-tiled accumulator path if even tm=64 exceeds the VMEM
    # budget (only possible for enormous input_size, never at EDLayer scale).

    if B <= tm_cap:
        tm = max(8, _round_up(B, 8))
        Bp = tm
    else:
        tm = tm_cap
        Bp = _round_up(B, tm)
    num_m = Bp // tm

    # v7x has 2 TensorCores; give "parallel" axes >=2 steps for non-trivial
    # problems so the second core is not idle.
    if num_m * num_n == 1:
        if Bp >= 256 and Bp % 16 == 0:
            tm = Bp // 2
            num_m = 2
        elif Np >= 256 and Np % 256 == 0:
            tn = Np // 2
            num_n = 2

    # Pad x only on the batch dim and only when B is not tile-aligned.
    # No dtype cast and no K padding here (K is a full-extent block).
    x_in = x
    if Bp != B:
        x_in = jnp.pad(x, ((0, Bp - B), (0, 0)))

    flops = 2 * Bp * K * Np
    bytes_accessed = (num_n * Bp * K * x_in.dtype.itemsize   # x, once per N tile
                      + K * Np * w_fused.dtype.itemsize      # weight streamed once
                      + Np * 4                                # bias
                      + Bp * Np * out_isz)                    # output

    out = pl.pallas_call(
        ed_layer_kernel,
        out_shape=jax.ShapeDtypeStruct((Bp, Np), out_dtype),
        grid_spec=pltpu.PrefetchScalarGridSpec(
            num_scalar_prefetch=0,
            # N outer / M inner: the (K, tn) weight and bias tiles keep the same
            # block index across all inner M steps -> DMAed from HBM exactly once.
            grid=(num_n, num_m),
            in_specs=[
                pl.BlockSpec((tm, K), lambda j, i: (i, 0)),   # x tile
                pl.BlockSpec((K, tn), lambda j, i: (0, j)),   # fused weight
                pl.BlockSpec((1, tn), lambda j, i: (0, j)),   # fused bias
            ],
            out_specs=pl.BlockSpec((tm, tn), lambda j, i: (i, j)),
        ),
        compiler_params=pltpu.CompilerParams(
            dimension_semantics=("parallel", "parallel")),
        cost_estimate=pl.CostEstimate(flops=flops, transcendentals=0,
                                      bytes_accessed=bytes_accessed),
    )(x_in, w_fused, bias)

    if Bp != B or Np != N:
        out = out[:B, :N]
    return out


def make_ed_layer_params(key, input_size, output_size, last_layer=False,
                         dtype=jnp.float32):
    """Re-implementation of EDLayer.initialize_weights (PyTorch layout)."""
    out_features = output_size if last_layer else output_size * 2
    k_wp, k_bp, k_wn, k_bn = jax.random.split(key, 4)

    row_sign = jnp.where(jnp.arange(out_features) < output_size, -1.0, 1.0
                         ).astype(dtype)

    # fc_p: uniform[-1, 0], first `output_size` output rows negated.
    w_p = jax.random.uniform(k_wp, (out_features, input_size), dtype,
                             minval=-1.0, maxval=0.0) * row_sign[:, None]
    b_p = jax.random.uniform(k_bp, (out_features,), dtype,
                             minval=-1.0, maxval=0.0) * row_sign

    # fc_n: uniform[0, 1], first `output_size` output rows negated.
    w_n = jax.random.uniform(k_wn, (out_features, input_size), dtype,
                             minval=0.0, maxval=1.0) * row_sign[:, None]
    b_n = jax.random.uniform(k_bn, (out_features,), dtype,
                             minval=0.0, maxval=1.0) * row_sign

    return w_p, b_p, w_n, b_n


if __name__ == "__main__":
    # Small shapes consistent with the module: x is (B, 2 * input_size).
    B = 8
    input_size = 32
    output_size = 16
    last_layer = False

    key = jax.random.PRNGKey(0)
    k_x, k_params = jax.random.split(key)

    x = jax.random.normal(k_x, (B, 2 * input_size), jnp.float32)
    w_p, b_p, w_n, b_n = make_ed_layer_params(
        k_params, input_size, output_size, last_layer=last_layer)
    out_features = output_size if last_layer else output_size * 2

    # One-time parameter prep (fused/transposed/padded bf16 weights, folded f32 bias).
    w_fused, bias, _ = prepare_ed_layer_params(w_p, b_p, w_n, b_n)

    out = ed_layer_forward(x, w_fused, bias, out_features)
    out = jax.block_until_ready(out)

    # Pure-JAX f32 reference (kernel computes the matmul in bf16).
    x_p = x[:, :input_size]
    x_n = x[:, input_size:]
    ref = x_p @ w_p.T + b_p + x_n @ w_n.T + b_n

    assert out.shape == ref.shape, (out.shape, ref.shape)
    max_err = float(jnp.max(jnp.abs(out - ref)))
    assert jnp.allclose(out, ref, atol=1e-1, rtol=5e-2), max_err
    print("KERNEL_OK")
</pallas_src>

<mosaic_0001>
module attributes {stable_mosaic.version = 11 : i64} {
  func.func @ed_layer_kernel(%arg0: i32, %arg1: i32, %arg2: memref<8x64xf32, #tpu.memory_space<vmem>>, %arg3: memref<64x128xbf16, #tpu.memory_space<vmem>>, %arg4: memref<1x128xf32, #tpu.memory_space<vmem>>, %arg5: memref<8x128xf32, #tpu.memory_space<vmem>>) attributes {dimension_semantics = [#tpu.dimension_semantics<parallel>, #tpu.dimension_semantics<parallel>], iteration_bounds = array<i64: 1, 1>, scalar_prefetch = 0 : i64, scratch_operands = 0 : i64, tpu.core_type = #tpu.core_type<tc>, window_params = [{transform_indices = @transform_0, window_bounds = array<i64: 8, 64>}, {transform_indices = @transform_1, window_bounds = array<i64: 64, 128>}, {transform_indices = @transform_2, window_bounds = array<i64: 1, 128>}, {transform_indices = @transform_3, window_bounds = array<i64: 8, 128>}]} {
    %c0 = arith.constant 0 : index
    %c0_0 = arith.constant 0 : index
    %0 = vector.load %arg2[%c0, %c0_0] : memref<8x64xf32, #tpu.memory_space<vmem>>, vector<8x64xf32>
    %1 = arith.truncf %0 : vector<8x64xf32> to vector<8x64xbf16>
    %c0_1 = arith.constant 0 : index
    %c0_2 = arith.constant 0 : index
    %2 = vector.load %arg3[%c0_1, %c0_2] : memref<64x128xbf16, #tpu.memory_space<vmem>>, vector<64x128xbf16>
    %cst = arith.constant dense<0.000000e+00> : vector<8x128xf32>
    %3 = tpu.matmul %1, %2, %cst {dimension_numbers = #tpu.dot_dimension_numbers<[1], [0], [0], [1], [0, 0, 1, 1], [], []>} : vector<8x64xbf16>, vector<64x128xbf16>, vector<8x128xf32> -> vector<8x128xf32>
    %c0_3 = arith.constant 0 : index
    %c0_4 = arith.constant 0 : index
    %4 = vector.load %arg4[%c0_3, %c0_4] : memref<1x128xf32, #tpu.memory_space<vmem>>, vector<1x128xf32>
    %5 = vector.broadcast %4 : vector<1x128xf32> to vector<8x128xf32>
    %6 = arith.addf %3, %5 : vector<8x128xf32>
    %c0_5 = arith.constant 0 : index
    %c0_6 = arith.constant 0 : index
    %7 = vector.load %arg5[%c0_5, %c0_6] : memref<8x128xf32, #tpu.memory_space<vmem>>, vector<8x128xf32>
    tpu.vector_store %arg5[%c0_5, %c0_6], %6 {strides = array<i32>} : memref<8x128xf32, #tpu.memory_space<vmem>>, vector<8x128xf32>,
    return
  }
  func.func @transform_0(%arg0: i32, %arg1: i32) -> (i32, i32) {
    %c0_i32 = arith.constant 0 : i32
    %c0_i32_0 = arith.constant 0 : i32
    return %arg1, %c0_i32 : i32, i32
  }
  func.func @transform_1(%arg0: i32, %arg1: i32) -> (i32, i32) {
    %c0_i32 = arith.constant 0 : i32
    %c0_i32_0 = arith.constant 0 : i32
    return %c0_i32, %arg0 : i32, i32
  }
  func.func @transform_2(%arg0: i32, %arg1: i32) -> (i32, i32) {
    %c0_i32 = arith.constant 0 : i32
    %c0_i32_0 = arith.constant 0 : i32
    return %c0_i32, %arg0 : i32, i32
  }
  func.func @transform_3(%arg0: i32, %arg1: i32) -> (i32, i32) {
    %c0_i32 = arith.constant 0 : i32
    return %arg1, %arg0 : i32, i32
  }
}

</mosaic_0001>

<bundles_post_ra>
// kernel: tpu_custom_call.1
= control target key start
LH: loop header
LB: loop body
LE: loop exit
PB: predicated region body
PF: predicated region fallthrough
CT: control target
= control target key end

     0   :  { %8 = vsyncpa [#allocation3], 0  ;;  %s323_s0 = inlined_call_operand.hbm [shape: f32[8,64], index: 0, kind: input, shape index: {}]   ;;  %s324_s1 = inlined_call_operand.hbm [shape: bf16[64,128], index: 1, kind: input, shape index: {}]   ;;  %s325_s2 = inlined_call_operand.vmem [shape: f32[1,128], index: 2, kind: input, shape index: {}]   ;;  %s326_s3 = inlined_call_operand.hbm [shape: f32[8,128], index: 3, kind: output, shape index: {}]  }
   0x1   :  { %9 = vsyncpa [#allocation6], 0 }
   0x2   :  { %10 = vsyncpa [#allocation4], 0  ;;  %s250_s12 = smov [#allocation2]   ;;  %s251_s14 = smov [#allocation5]  }
   0x3   :  { %s17_s13 = sshll.u32 %s250_s12, 4  ;;  %s26_s15 = sshll.u32 %s251_s14, 4  ;;  %s18_s13 = int_to_ptr.vmem [resolvable:$true] %s17_s13  ;;  %s277_s15 = int_to_ptr.vmem [resolvable:$true] %s26_s15 }
   0x4   :  { %s178_s18 = scalar_lea.hbm %s323_s0, 128 }
   0x5   :  { %p179_p0 = scmp.ne.s32.totalorder %s323_s0, %s178_s18  ;;  %p182_p1 = scmp.lt.u32.totalorder %s178_s18, %s323_s0 }
   0x7   :  { %p184_p2 = pnand %p182_p1, %p179_p0 }
   0x9   :  { %187 = shalt.err (!%p184_p2)
}
   0xa   :  { %s188_s23 = scalar_lea.vmem %s18_s13, 128  ;;  %p193_p4 = scmp.lt.s32.totalorder %s18_s13, %s18_s13 }
   0xb   :  { %p189_p3 = scmp.ne.s32.totalorder %s18_s13, %s188_s23  ;;  %p194_p5 = scmp.lt.s32.totalorder %s188_s23, %s188_s23 }
   0xd   :  { %p195_p6 = por %p194_p5, %p193_p4 }
   0xf   :  { %p196_p7 = pnand %p195_p6, %p189_p3 }
  0x11   :  { %199 = shalt.err (!%p196_p7)
}
  0x12   :  { %20 = dma.hbm_to_vmem [thread:$0]  %s323_s0, 128, %s18_s13, [#allocation3]  }
  0x13   :  { %s200_s28 = scalar_lea.hbm %s324_s1, 512 }
  0x14   :  { %p201_p8 = scmp.ne.s32.totalorder %s324_s1, %s200_s28  ;;  %p204_p9 = scmp.lt.u32.totalorder %s200_s28, %s324_s1 }
  0x16   :  { %p206_p10 = pnand %p204_p9, %p201_p8 }
  0x18   :  { %209 = shalt.err (!%p206_p10)
}
  0x19   :  { %s210_s6 = scalar_lea.vmem %s277_s15, 512  ;;  %p215_p12 = scmp.lt.s32.totalorder %s277_s15, %s277_s15 }
  0x1a   :  { %p211_p11 = scmp.ne.s32.totalorder %s277_s15, %s210_s6  ;;  %p216_p13 = scmp.lt.s32.totalorder %s210_s6, %s210_s6 }
  0x1c   :  { %p217_p0 = por %p216_p13, %p215_p12 }
  0x1e   :  { %p218_p1 = pnand %p217_p0, %p211_p11 }
  0x20   :  { %221 = shalt.err (!%p218_p1)
}
  0x21   :  { %s252_s0 = smov 64   ;;  %s253_s7 = smov 4  }
  0x22   :  { %32 = dma.hbm_to_vmem [thread:$0]  %s324_s1, 512, %s277_s15, [#allocation6], %s252_s0, %s252_s0, %s253_s7  }
  0x23   :  { %244 = dma.done.wait [#allocation3], 128  }
  0x24   :  { %245 = vsyncadd [#allocation3], 4294967168 }
  0x25   :  { %246 = dma.done.wait [#allocation6], 512  }
  0x26   :  { %247 = vsyncadd [#allocation6], 4294966784  ;;  %v254_v0 = vmov 0.0   ;;  %vm255_vm0 = vmmov 0   ;;  %v174_v1 = vld [vmem:[#allocation5] sm:$0xff]   ;;  %v175_v2 = vld [vmem:[#allocation5 + $0x8] sm:$0xff]  }
  0x27   :  { %155 = vmatprep.subr.bf16.mxu0 %v254_v0  ;;  %163 = vmatprep.mubr.msk.bf16.mxu0 %vm255_vm0, %v254_v0  ;;  %v176_v3 = vld [vmem:[#allocation5 + $0x10] sm:$0xff]   ;;  %v177_v4 = vld [vmem:[#allocation5 + $0x18] sm:$0xff]   ;;  %vm83_vm1 = vcmask 523264   ;;  %s256_s11 = smov [#allocation7]  }
  0x28   :  { %156 = vmatpush3.bf16.msra.mxu0 %v174_v1  ;;  %v42_v5 = vld [vmem:[#allocation2] sm:$0xff]  ;;  %s134_s12 = sshll.u32 %s256_s11, 4  ;;  %s135_s12 = int_to_ptr.vmem [resolvable:$true] %s134_s12 }
  0x29   :  { %157 = vmatprep.subr.bf16.mxu0 %v254_v0  ;;  %v43_v6 = vpack.c.bf16 %v42_v5, %v42_v5  ;;  %v144_v7 = vld [vmem:[%s325_s2] ss:$0 sm:$0xff]  ;;  %s222_s13 = scalar_lea.vmem %s135_s12, 128  ;;  %p227_p3 = scmp.lt.s32.totalorder %s135_s12, %s135_s12 }
  0x2a   :  { %p223_p2 = scmp.ne.s32.totalorder %s135_s12, %s222_s13  ;;  %p228_p4 = scmp.lt.s32.totalorder %s222_s13, %s222_s13 }
  0x2c   :  { %158 = vmatpush3.bf16.msra.mxu0 %v175_v2  ;;  %p229_p5 = por %p228_p4, %p227_p3 }
  0x2d   :  { %159 = vmatprep.subr.bf16.mxu0 %v254_v0 }
  0x2e   :  { %p230_p6 = pnand %p229_p5, %p223_p2 }
  0x30   :  { %160 = vmatpush3.bf16.msra.mxu0 %v176_v3 }
  0x31   :  { %161 = vmatprep.subr.bf16.mxu0 %v254_v0 }
  0x34   :  { %162 = vmatpush3.bf16.msra.mxu0 %v177_v4 }
  0x37   :  { %164 = vmatmul.mubr.msk.bf16.vlgmr.msra.gmra.mrb[0].mxu0 %vm83_vm1, %v43_v6 }
 0x10a   :  { %v121_v8 = vpop.f32.mrb[0].mxu0 }
 0x10b   :  { %v122_v9 = vadd.f32 %v144_v7, %v121_v8  ;;  %v165_v10 = vpop.f32.mrb[1].mxu0 }
 0x10c   :  { %v124_v11 = vpop.f32.mrb[2].mxu0 }
 0x10d   :  { %127 = vst [vmem:[#allocation7] sm:$0xff] %v122_v9  ;;  %v166_v12 = vpop.f32.mrb[3].mxu0 }
 0x10e   :  { %233 = shalt.err (!%p230_p6)
}
 0x10f   :  { %s234_s2 = scalar_lea.hbm %s326_s3, 128 }
 0x110   :  { %p235_p7 = scmp.ne.s32.totalorder %s326_s3, %s234_s2  ;;  %p238_p8 = scmp.lt.u32.totalorder %s234_s2, %s326_s3 }
 0x112   :  { %p240_p9 = pnand %p238_p8, %p235_p7 }
 0x114   :  { %243 = shalt.err (!%p240_p9)
}
 0x115   :  { %137 = dma.vmem_to_hbm [thread:$0]  %s135_s12, 128, %s326_s3, [#allocation4]  }
 0x116   :  { %248 = dma.done.wait [#allocation4], 128  }
 0x117   :  { %249 = vsyncadd [#allocation4], 4294967168 }
 0x118   :  { %141 = vsyncpa [#allocation3], 1 }
 0x119   :  { %142 = vsyncpa [#allocation6], 1 }
 0x11a   :  { %143 = vsyncpa [#allocation4], 1 }

</bundles_post_ra>
